<compile_context>
chip_gen: v7x
topology: tpu7x:2x2x1
jax: 0.10.0
libtpu: 0.0.40
codegen_flags: <defaults>
</compile_context>

<pallas_src>
import functools

import jax
import jax.numpy as jnp
from jax import lax
from jax.experimental import pallas as pl
from jax.experimental.pallas import tpu as pltpu

NEG_FILL = -1e16
LEAKY_SLOPE = 0.01  # nn.LeakyReLU() default negative_slope


def _net_kernel(x_ref, hmask_ref, adj1_ref, adj2_ref, wh_ref, bh_ref, wo_ref,
                bo_ref, o_ref, *, n_heads: int, batch: int, nodes: int):
    """Fused GAT forward for the whole (tiny) batch.

    x_ref:     [B, N, C]              node features
    hmask_ref: [H*B*N, H*hid]         lane mask: copy r//(B*N) keeps head lanes only
    adj1_ref:  [H*B*N, H*B*N]         kron(eye(H*B), adj01) block-diagonal adjacency
    adj2_ref:  [B*N, B*N]             kron(eye(B), adj01)
    wh_ref:    [C, H*hid]             all head weights stacked (W_i.T concatenated)
    bh_ref:    [1, H*hid]             all head biases stacked
    wo_ref:    [H*hid, out_c]         output layer weight (W.T)
    bo_ref:    [1, out_c]             output layer bias
    o_ref:     [B, N, out_c]          log_softmax output
    """
    bn = batch * nodes
    x2d = x_ref[...].reshape(bn, x_ref.shape[-1])                   # [B*N, C]

    # Head projections for all heads and both batch elements: one MXU call.
    h_all = jnp.dot(x2d, wh_ref[...],
                    preferred_element_type=jnp.float32)             # [B*N, H*hid]

    # n_heads sublane copies, each lane-masked to its own head's features.
    # Row r belongs to group g = r // N  (head = r // (B*N), batch = (r//N) % B);
    # L[g*N + n, :] is h_{head,batch}[n] placed in that head's lanes, 0 elsewhere.
    L = jnp.concatenate([h_all] * n_heads, axis=0) * hmask_ref[...]  # [H*B*N, H*hid]

    # All B*H attention blocks at once: one 128-wide score matmul, lane-dense
    # softmax, one aggregation matmul.  adj1 both applies the adjacency inside
    # every diagonal block (faithful to `scores * adj; fill(==0, -1e16)`) and
    # zeroes the off-diagonal cross-head / cross-batch blocks, which then also
    # get -1e16 and vanish (exactly 0) in the softmax.
    s = lax.dot_general(L, L, (((1,), (1,)), ((), ())),
                        preferred_element_type=jnp.float32) * adj1_ref[...]
    s = jnp.where(s == 0.0, NEG_FILL, s)
    m = jnp.max(s, axis=-1, keepdims=True)
    e = jnp.exp(s - m)
    att = e / jnp.sum(e, axis=-1, keepdims=True)                    # exact softmax
    o_blk = jnp.dot(att, L, preferred_element_type=jnp.float32)     # [H*B*N, H*hid]

    # Sublane tile i holds head i's output in head-i lanes only; summing the
    # tiles reconstructs the lane concatenation with no lane shuffles.
    hcat = o_blk[0:bn]
    for i in range(1, n_heads):
        hcat = hcat + o_blk[i * bn:(i + 1) * bn]                    # [B*N, H*hid]
    hcat = hcat + bh_ref[...]
    hcat = jnp.where(hcat >= 0.0, hcat, LEAKY_SLOPE * hcat)         # GAT.act

    # Output attention layer: both batch blocks at once via kron(eye(B), adj).
    h2 = jnp.dot(hcat, wo_ref[...],
                 preferred_element_type=jnp.float32)                # [B*N, out_c]
    s2 = lax.dot_general(h2, h2, (((1,), (1,)), ((), ())),
                         preferred_element_type=jnp.float32) * adj2_ref[...]
    s2 = jnp.where(s2 == 0.0, NEG_FILL, s2)
    m2 = jnp.max(s2, axis=-1, keepdims=True)
    e2 = jnp.exp(s2 - m2)
    att2 = e2 / jnp.sum(e2, axis=-1, keepdims=True)
    out = jnp.dot(att2, h2, preferred_element_type=jnp.float32) + bo_ref[...]
    out = jnp.where(out >= 0.0, out, LEAKY_SLOPE * out)             # GAT.act (2nd)

    # F.log_softmax(x, dim=1): over the node axis within each batch element.
    out3 = out.reshape(batch, nodes, out.shape[-1])                 # [B, N, out_c]
    mn = jnp.max(out3, axis=1, keepdims=True)
    lse = jnp.log(jnp.sum(jnp.exp(out3 - mn), axis=1, keepdims=True)) + mn
    o_ref[...] = (out3 - lse).astype(o_ref.dtype)                   # one store


def net_forward(params, x, graph):
    """Net.forward: dropout (eval-mode identity) -> GAT -> log_softmax(dim=1)."""
    # TODO(synk): F.dropout is stochastic in training mode; treated as identity (eval).
    B, N, in_c = x.shape
    n_heads = len(params["head_w"])
    hid_c = params["head_w"][0].shape[1]
    d_all = n_heads * hid_c
    out_c = params["out_w"].shape[1]
    bn = B * N

    # Stack all head parameters so the kernel does a single projection matmul.
    w_heads = jnp.concatenate(params["head_w"], axis=1)             # [in_c, H*hid]
    b_heads = jnp.concatenate(params["head_b"], axis=0).reshape(1, d_all)
    w_out = params["out_w"]                                         # [H*hid, out_c]
    b_out = params["out_b"].reshape(1, out_c)

    # Binarized adjacency (semantics of torch.where(graph > 0, 1, 0)).
    adj01 = jnp.where(graph > 0, 1.0, 0.0).astype(jnp.float32)      # [N, N]

    # Block-diagonal adjacency masks (precomputed, batch/head invariant) so all
    # B*H (resp. B) attention blocks run as ONE lane-dense softmax + matmul.
    adj1 = jnp.kron(jnp.eye(n_heads * B, dtype=jnp.float32), adj01)  # [H*B*N, H*B*N]
    adj2 = jnp.kron(jnp.eye(B, dtype=jnp.float32), adj01)            # [B*N, B*N]

    # Lane mask: sublane-copy r // (B*N) keeps only its own head's 16 lanes.
    row_head = jnp.arange(n_heads * bn, dtype=jnp.int32) // bn
    col_head = jnp.arange(d_all, dtype=jnp.int32) // hid_c
    head_mask = (row_head[:, None] == col_head[None, :]).astype(jnp.float32)

    kernel = functools.partial(_net_kernel, n_heads=n_heads, batch=B, nodes=N)

    P = n_heads * bn
    flops = (2 * bn * in_c * d_all          # head projections
             + 2 * P * d_all * P            # block-diag scores
             + 2 * P * P * d_all            # block-diag aggregation
             + 2 * bn * d_all * out_c       # output projection
             + 2 * bn * out_c * bn          # output scores
             + 2 * bn * bn * out_c)         # output aggregation
    transcendentals = P * P + bn * bn + 2 * bn * out_c
    bytes_accessed = 4 * int(x.size + head_mask.size + adj1.size + adj2.size
                             + w_heads.size + b_heads.size + w_out.size
                             + b_out.size + B * N * out_c)

    vmem_spec = pl.BlockSpec(memory_space=pltpu.MemorySpace.VMEM)
    return pl.pallas_call(
        kernel,
        out_shape=jax.ShapeDtypeStruct((B, N, out_c), jnp.float32),
        in_specs=[vmem_spec] * 8,
        out_specs=vmem_spec,
        cost_estimate=pl.CostEstimate(flops=int(flops),
                                      transcendentals=int(transcendentals),
                                      bytes_accessed=bytes_accessed),
    )(x, head_mask, adj1, adj2, w_heads, b_heads, w_out, b_out)


def init_params(key, in_c, hid_c, out_c, n_heads):
    """nn.init.normal_ (std=1) for all layer weights and biases, deterministic."""
    keys = jax.random.split(key, 2 * n_heads + 2)
    head_w = [jax.random.normal(keys[2 * i], (in_c, hid_c), jnp.float32)
              for i in range(n_heads)]
    head_b = [jax.random.normal(keys[2 * i + 1], (hid_c,), jnp.float32)
              for i in range(n_heads)]
    out_w = jax.random.normal(keys[-2], (hid_c * n_heads, out_c), jnp.float32)
    out_b = jax.random.normal(keys[-1], (out_c,), jnp.float32)
    return {"head_w": head_w, "head_b": head_b, "out_w": out_w, "out_b": out_b}


if __name__ == "__main__":
    B, N, IN_C, HID_C, OUT_C, HEADS = 2, 16, 8, 16, 7, 4

    key = jax.random.PRNGKey(0)
    kx, kg, kp = jax.random.split(key, 3)

    x = jax.random.normal(kx, (B, N, IN_C), jnp.float32)

    # TODO(synk): Net passes a sparse edge_index [2, E]; GraphAttentionLayer consumes a
    # dense [N, N] adjacency, so a deterministic dense adjacency is built directly here.
    adj = (jax.random.uniform(kg, (N, N)) > 0.6).astype(jnp.float32)
    adj = jnp.maximum(adj, jnp.eye(N, dtype=jnp.float32))  # self loops -> no empty rows

    params = init_params(kp, IN_C, HID_C, OUT_C, HEADS)

    out = jax.jit(net_forward)(params, x, adj)
    out = jax.block_until_ready(out)

    assert out.shape == (B, N, OUT_C), out.shape
    assert bool(jnp.all(jnp.isfinite(out)))
    # log_softmax over dim=1 => exp(out) sums to 1 along the node axis
    sums = jnp.sum(jnp.exp(out), axis=1)
    assert bool(jnp.all(jnp.abs(sums - 1.0) < 1e-3)), sums

    print("KERNEL_OK")
</pallas_src>

<mosaic_0001>
module attributes {stable_mosaic.version = 11 : i64} {
  func.func @_net_kernel(%arg0: memref<2x16x8xf32, #tpu.memory_space<vmem>>, %arg1: memref<128x64xf32, #tpu.memory_space<vmem>>, %arg2: memref<128x128xf32, #tpu.memory_space<vmem>>, %arg3: memref<32x32xf32, #tpu.memory_space<vmem>>, %arg4: memref<8x64xf32, #tpu.memory_space<vmem>>, %arg5: memref<1x64xf32, #tpu.memory_space<vmem>>, %arg6: memref<64x7xf32, #tpu.memory_space<vmem>>, %arg7: memref<1x7xf32, #tpu.memory_space<vmem>>, %arg8: memref<2x16x7xf32, #tpu.memory_space<vmem>>) attributes {dimension_semantics = [], scalar_prefetch = 0 : i64, scratch_operands = 0 : i64, tpu.core_type = #tpu.core_type<tc>} {
    %c0 = arith.constant 0 : index
    %c0_0 = arith.constant 0 : index
    %c0_1 = arith.constant 0 : index
    %0 = vector.load %arg0[%c0, %c0_0, %c0_1] : memref<2x16x8xf32, #tpu.memory_space<vmem>>, vector<2x16x8xf32>
    %1 = vector.shape_cast %0 : vector<2x16x8xf32> to vector<32x8xf32>
    %c0_2 = arith.constant 0 : index
    %c0_3 = arith.constant 0 : index
    %2 = vector.load %arg4[%c0_2, %c0_3] : memref<8x64xf32, #tpu.memory_space<vmem>>, vector<8x64xf32>
    %cst = arith.constant dense<0.000000e+00> : vector<32x64xf32>
    %3 = tpu.matmul %1, %2, %cst {dimension_numbers = #tpu.dot_dimension_numbers<[1], [0], [0], [1], [0, 0, 1, 1], [], []>} : vector<32x8xf32>, vector<8x64xf32>, vector<32x64xf32> -> vector<32x64xf32>
    %4 = tpu.concatenate %3, %3, %3, %3 in 0 : vector<32x64xf32>, vector<32x64xf32>, vector<32x64xf32>, vector<32x64xf32> -> vector<128x64xf32>
    %c0_4 = arith.constant 0 : index
    %c0_5 = arith.constant 0 : index
    %5 = vector.load %arg1[%c0_4, %c0_5] : memref<128x64xf32, #tpu.memory_space<vmem>>, vector<128x64xf32>
    %6 = arith.mulf %4, %5 : vector<128x64xf32>
    %cst_6 = arith.constant dense<0.000000e+00> : vector<128x128xf32>
    %7 = tpu.matmul %6, %6, %cst_6 {dimension_numbers = #tpu.dot_dimension_numbers<[1], [1], [0], [0], [0, 0, 1, 0], [], []>} : vector<128x64xf32>, vector<128x64xf32>, vector<128x128xf32> -> vector<128x128xf32>
    %c0_7 = arith.constant 0 : index
    %c0_8 = arith.constant 0 : index
    %8 = vector.load %arg2[%c0_7, %c0_8] : memref<128x128xf32, #tpu.memory_space<vmem>>, vector<128x128xf32>
    %9 = arith.mulf %7, %8 : vector<128x128xf32>
    %cst_9 = arith.constant 0.000000e+00 : f32
    %10 = vector.broadcast %cst_9 : f32 to vector<128x128xf32>
    %11 = arith.cmpf oeq, %9, %10 : vector<128x128xf32>
    %cst_10 = arith.constant -1.000000e+16 : f32
    %12 = vector.broadcast %cst_10 : f32 to vector<128x128xf32>
    %13 = arith.select %11, %12, %9 : vector<128x128xi1>, vector<128x128xf32>
    %cst_11 = arith.constant dense<0xFF800000> : vector<128xf32>
    %14 = vector.multi_reduction <maximumf>, %13, %cst_11 [1] : vector<128x128xf32> to vector<128xf32>
    %15 = vector.shape_cast %14 : vector<128xf32> to vector<128x1xf32>
    %16 = vector.broadcast %15 : vector<128x1xf32> to vector<128x128xf32>
    %17 = arith.subf %13, %16 : vector<128x128xf32>
    %18 = math.exp %17 : vector<128x128xf32>
    %cst_12 = arith.constant dense<0.000000e+00> : vector<128xf32>
    %19 = vector.multi_reduction <add>, %18, %cst_12 [1] : vector<128x128xf32> to vector<128xf32>
    %20 = vector.shape_cast %19 : vector<128xf32> to vector<128x1xf32>
    %21 = vector.broadcast %20 : vector<128x1xf32> to vector<128x128xf32>
    %22 = arith.divf %18, %21 : vector<128x128xf32>
    %cst_13 = arith.constant dense<0.000000e+00> : vector<128x64xf32>
    %23 = tpu.matmul %22, %6, %cst_13 {dimension_numbers = #tpu.dot_dimension_numbers<[1], [0], [0], [1], [0, 0, 1, 1], [], []>} : vector<128x128xf32>, vector<128x64xf32>, vector<128x64xf32> -> vector<128x64xf32>
    %24 = vector.extract_strided_slice %23 {offsets = [0, 0], sizes = [32, 64], strides = [1, 1]} : vector<128x64xf32> to vector<32x64xf32>
    %25 = vector.extract_strided_slice %23 {offsets = [32, 0], sizes = [32, 64], strides = [1, 1]} : vector<128x64xf32> to vector<32x64xf32>
    %26 = arith.addf %24, %25 : vector<32x64xf32>
    %27 = vector.extract_strided_slice %23 {offsets = [64, 0], sizes = [32, 64], strides = [1, 1]} : vector<128x64xf32> to vector<32x64xf32>
    %28 = arith.addf %26, %27 : vector<32x64xf32>
    %29 = vector.extract_strided_slice %23 {offsets = [96, 0], sizes = [32, 64], strides = [1, 1]} : vector<128x64xf32> to vector<32x64xf32>
    %30 = arith.addf %28, %29 : vector<32x64xf32>
    %c0_14 = arith.constant 0 : index
    %c0_15 = arith.constant 0 : index
    %31 = vector.load %arg5[%c0_14, %c0_15] : memref<1x64xf32, #tpu.memory_space<vmem>>, vector<1x64xf32>
    %32 = vector.broadcast %31 : vector<1x64xf32> to vector<32x64xf32>
    %33 = arith.addf %30, %32 : vector<32x64xf32>
    %cst_16 = arith.constant 0.000000e+00 : f32
    %34 = vector.broadcast %cst_16 : f32 to vector<32x64xf32>
    %35 = arith.cmpf oge, %33, %34 : vector<32x64xf32>
    %cst_17 = arith.constant 0.00999999977 : f32
    %36 = vector.broadcast %cst_17 : f32 to vector<32x64xf32>
    %37 = arith.mulf %36, %33 : vector<32x64xf32>
    %38 = arith.select %35, %33, %37 : vector<32x64xi1>, vector<32x64xf32>
    %c0_18 = arith.constant 0 : index
    %c0_19 = arith.constant 0 : index
    %39 = vector.load %arg6[%c0_18, %c0_19] : memref<64x7xf32, #tpu.memory_space<vmem>>, vector<64x7xf32>
    %cst_20 = arith.constant dense<0.000000e+00> : vector<32x7xf32>
    %40 = tpu.matmul %38, %39, %cst_20 {dimension_numbers = #tpu.dot_dimension_numbers<[1], [0], [0], [1], [0, 0, 1, 1], [], []>} : vector<32x64xf32>, vector<64x7xf32>, vector<32x7xf32> -> vector<32x7xf32>
    %cst_21 = arith.constant dense<0.000000e+00> : vector<32x32xf32>
    %41 = tpu.matmul %40, %40, %cst_21 {dimension_numbers = #tpu.dot_dimension_numbers<[1], [1], [0], [0], [0, 0, 1, 0], [], []>} : vector<32x7xf32>, vector<32x7xf32>, vector<32x32xf32> -> vector<32x32xf32>
    %c0_22 = arith.constant 0 : index
    %c0_23 = arith.constant 0 : index
    %42 = vector.load %arg3[%c0_22, %c0_23] : memref<32x32xf32, #tpu.memory_space<vmem>>, vector<32x32xf32>
    %43 = arith.mulf %41, %42 : vector<32x32xf32>
    %cst_24 = arith.constant 0.000000e+00 : f32
    %44 = vector.broadcast %cst_24 : f32 to vector<32x32xf32>
    %45 = arith.cmpf oeq, %43, %44 : vector<32x32xf32>
    %cst_25 = arith.constant -1.000000e+16 : f32
    %46 = vector.broadcast %cst_25 : f32 to vector<32x32xf32>
    %47 = arith.select %45, %46, %43 : vector<32x32xi1>, vector<32x32xf32>
    %cst_26 = arith.constant dense<0xFF800000> : vector<32xf32>
    %48 = vector.multi_reduction <maximumf>, %47, %cst_26 [1] : vector<32x32xf32> to vector<32xf32>
    %49 = vector.shape_cast %48 : vector<32xf32> to vector<32x1xf32>
    %50 = vector.broadcast %49 : vector<32x1xf32> to vector<32x32xf32>
    %51 = arith.subf %47, %50 : vector<32x32xf32>
    %52 = math.exp %51 : vector<32x32xf32>
    %cst_27 = arith.constant dense<0.000000e+00> : vector<32xf32>
    %53 = vector.multi_reduction <add>, %52, %cst_27 [1] : vector<32x32xf32> to vector<32xf32>
    %54 = vector.shape_cast %53 : vector<32xf32> to vector<32x1xf32>
    %55 = vector.broadcast %54 : vector<32x1xf32> to vector<32x32xf32>
    %56 = arith.divf %52, %55 : vector<32x32xf32>
    %cst_28 = arith.constant dense<0.000000e+00> : vector<32x7xf32>
    %57 = tpu.matmul %56, %40, %cst_28 {dimension_numbers = #tpu.dot_dimension_numbers<[1], [0], [0], [1], [0, 0, 1, 1], [], []>} : vector<32x32xf32>, vector<32x7xf32>, vector<32x7xf32> -> vector<32x7xf32>
    %c0_29 = arith.constant 0 : index
    %c0_30 = arith.constant 0 : index
    %58 = vector.load %arg7[%c0_29, %c0_30] : memref<1x7xf32, #tpu.memory_space<vmem>>, vector<1x7xf32>
    %59 = vector.broadcast %58 : vector<1x7xf32> to vector<32x7xf32>
    %60 = arith.addf %57, %59 : vector<32x7xf32>
    %cst_31 = arith.constant 0.000000e+00 : f32
    %61 = vector.broadcast %cst_31 : f32 to vector<32x7xf32>
    %62 = arith.cmpf oge, %60, %61 : vector<32x7xf32>
    %cst_32 = arith.constant 0.00999999977 : f32
    %63 = vector.broadcast %cst_32 : f32 to vector<32x7xf32>
    %64 = arith.mulf %63, %60 : vector<32x7xf32>
    %65 = arith.select %62, %60, %64 : vector<32x7xi1>, vector<32x7xf32>
    %66 = vector.shape_cast %65 : vector<32x7xf32> to vector<2x16x7xf32>
    %cst_33 = arith.constant dense<0xFF800000> : vector<2x7xf32>
    %67 = vector.multi_reduction <maximumf>, %66, %cst_33 [1] : vector<2x16x7xf32> to vector<2x7xf32>
    %68 = vector.shape_cast %67 : vector<2x7xf32> to vector<2x1x7xf32>
    %69 = vector.broadcast %68 : vector<2x1x7xf32> to vector<2x16x7xf32>
    %70 = arith.subf %66, %69 : vector<2x16x7xf32>
    %71 = math.exp %70 : vector<2x16x7xf32>
    %cst_34 = arith.constant dense<0.000000e+00> : vector<2x7xf32>
    %72 = vector.multi_reduction <add>, %71, %cst_34 [1] : vector<2x16x7xf32> to vector<2x7xf32>
    %73 = vector.shape_cast %72 : vector<2x7xf32> to vector<2x1x7xf32>
    %74 = math.log %73 : vector<2x1x7xf32>
    %75 = arith.addf %74, %68 : vector<2x1x7xf32>
    %76 = vector.broadcast %75 : vector<2x1x7xf32> to vector<2x16x7xf32>
    %77 = arith.subf %66, %76 : vector<2x16x7xf32>
    %c0_35 = arith.constant 0 : index
    %c0_36 = arith.constant 0 : index
    %c0_37 = arith.constant 0 : index
    %78 = vector.load %arg8[%c0_35, %c0_36, %c0_37] : memref<2x16x7xf32, #tpu.memory_space<vmem>>, vector<2x16x7xf32>
    tpu.vector_store %arg8[%c0_35, %c0_36, %c0_37], %77 {strides = array<i32>} : memref<2x16x7xf32, #tpu.memory_space<vmem>>, vector<2x16x7xf32>,
    return
  }
}

</mosaic_0001>

<bundles_post_ra>
// kernel: net_forward.1
= control target key start
LH: loop header
LB: loop body
LE: loop exit
PB: predicated region body
PF: predicated region fallthrough
CT: control target
= control target key end

     0   :  { %vm34_vm0 = vcmask 64512   ;;  %vm164_vm1 = vcmask 523264   ;;  %s2195_s4 = inlined_call_operand.vmem [shape: f32[8,64], index: 4, kind: input, shape index: {}]   ;;  %s2196_s0 = inlined_call_operand.vmem [shape: f32[2,16,8], index: 0, kind: input, shape index: {}]   ;;  %s2197_s1 = inlined_call_operand.vmem [shape: f32[128,64], index: 1, kind: input, shape index: {}]   ;;  %s2198_s2 = inlined_call_operand.vmem [shape: f32[128,128], index: 2, kind: input, shape index: {}]   ;;  %s2199_s6 = inlined_call_operand.vmem [shape: f32[64,7], index: 6, kind: input, shape index: {}]   ;;  %s2200_s5 = inlined_call_operand.vmem [shape: f32[1,64], index: 5, kind: input, shape index: {}]   ;;  %s2201_s3 = inlined_call_operand.vmem [shape: f32[32,32], index: 3, kind: input, shape index: {}]   ;;  %s2202_s7 = inlined_call_operand.vmem [shape: f32[1,7], index: 7, kind: input, shape index: {}]   ;;  %s2203_s8 = inlined_call_operand.vmem [shape: f32[2,16,7], index: 8, kind: output, shape index: {}]  }
   0x1   :  { %v33_v0 = vld [vmem:[%s2195_s4] sm:$0xff]  ;;  %v30_v2 = vld [vmem:[%s2196_s0 + $0x8] sm:$0xff]  ;;  %v31_v3 = vld [vmem:[%s2196_s0 + $0x10] sm:$0xff] }
   0x2   :  { %v29_v1 = vld [vmem:[%s2196_s0] sm:$0xff]  ;;  %1343 = vmatprep.subr.mxu0 %v33_v0  ;;  %v32_v4 = vld [vmem:[%s2196_s0 + $0x18] sm:$0xff]  ;;  %v133_v5 = vld [vmem:[%s2197_s1 + $0x8] sm:$0xff] }
   0x3   :  { %1345 = vmatprep.mubr.msk.f32.mxu0 %vm34_vm0, %v29_v1  ;;  %1344 = vmatpush3.msra.mxu0 %v33_v0  ;;  %v132_v6 = vld [vmem:[%s2197_s1] sm:$0xff]  ;;  %v135_v10 = vld [vmem:[%s2197_s1 + $0x18] sm:$0xff]  ;;  %v134_v12 = vld [vmem:[%s2197_s1 + $0x10] sm:$0xff] }
   0x4   :  { %1346 = vmatmul.mubr.msk.f32.vlgmr.msra.gmra.mrb[0].mxu0 %vm34_vm0, %v30_v2  ;;  %vm1809_vm2 = vmpackc.low %vm164_vm1, %vm164_vm1  ;;  %v137_v14 = vld [vmem:[%s2197_s1 + $0x28] sm:$0xff]  ;;  %v136_v15 = vld [vmem:[%s2197_s1 + $0x20] sm:$0xff] }
   0x5   :  { %1348 = vmatprep.mubr.msk.f32.mxu0 %vm34_vm0, %v31_v3  ;;  %v139_v23 = vld [vmem:[%s2197_s1 + $0x38] sm:$0xff]  ;;  %v138_v24 = vld [vmem:[%s2197_s1 + $0x30] sm:$0xff]  ;;  %v141_v29 = vld [vmem:[%s2197_s1 + $0x48] sm:$0xff] }
   0x6   :  { %v140_v30 = vld [vmem:[%s2197_s1 + $0x40] sm:$0xff]  ;;  %v143_v34 = vld [vmem:[%s2197_s1 + $0x58] sm:$0xff]  ;;  %v142_v35 = vld [vmem:[%s2197_s1 + $0x50] sm:$0xff] }
   0x7   :  { %v145_v39 = vld [vmem:[%s2197_s1 + $0x68] sm:$0xff]  ;;  %v144_v40 = vld [vmem:[%s2197_s1 + $0x60] sm:$0xff]  ;;  %v147_v44 = vld [vmem:[%s2197_s1 + $0x78] sm:$0xff] }
   0x8   :  { %1349 = vmatmul.mubr.msk.f32.gmra.mrb[2].mxu0 %vm34_vm0, %v32_v4  ;;  %v146_v45 = vld [vmem:[%s2197_s1 + $0x70] sm:$0xff]  ;;  %v359_v50 = vld [vmem:[%s2198_s2 + $0x8] sm:$0xff]  ;;  %v358_v51 = vld [vmem:[%s2198_s2] sm:$0xff] }
   0x9   :  { %v361_v56 = vld [vmem:[%s2198_s2 + $0x18] sm:$0xff]  ;;  %v360_v57 = vld [vmem:[%s2198_s2 + $0x10] sm:$0xff]  ;;  %v363_v63 = vld [vmem:[%s2198_s2 + $0x28] sm:$0xff] }
   0xa   :  { %v362_v0 = vld [vmem:[%s2198_s2 + $0x20] sm:$0xff] }
  0xd7   :  { %v1347_v7 = vpop.f32.mrb[0].mxu0 }
  0xd8   :  { %v113_v8 = vpop.f32.mrb[1].mxu0  ;;  %v1799_v9 = vmul.f32 %v1347_v7, %v133_v5  ;;  %v1827_v21 = vmul.f32 %v1347_v7, %v137_v14  ;;  %v157_v31 = vmul.f32 %v1347_v7, %v141_v29  ;;  %v161_v41 = vmul.f32 %v1347_v7, %v145_v39  ;;  %v365_v7 = vld [vmem:[%s2198_s2 + $0x38] sm:$0xff] }
  0xd9   :  { %v148_v11 = vmul.f32 %v132_v6, %v113_v8  ;;  %v152_v22 = vmul.f32 %v136_v15, %v113_v8  ;;  %v156_v32 = vmul.f32 %v140_v30, %v113_v8  ;;  %v160_v42 = vmul.f32 %v144_v40, %v113_v8  ;;  %v364_v8 = vld [vmem:[%s2198_s2 + $0x30] sm:$0xff]  ;;  %v367_v15 = vld [vmem:[%s2198_s2 + $0x48] sm:$0xff]  ;;  %v373_v39 = vld [vmem:[%s2198_s2 + $0x78] sm:$0xff] }
  0xda   :  { %v372_v40 = vld [vmem:[%s2198_s2 + $0x70] sm:$0xff] }
  0xdb   :  { %v1350_v16 = vpop.f32.mrb[2].mxu0  ;;  %v1513_v17 = vpack.c.bf16 %v1799_v9, %v148_v11  ;;  %1383 = vmatprep.mubr.msk.f32.mxu1 %vm164_vm1, %v148_v11  ;;  %v1525_v28 = vpack.c.bf16 %v1827_v21, %v152_v22  ;;  %v1537_v38 = vpack.c.bf16 %v157_v31, %v156_v32  ;;  %v1549_v48 = vpack.c.bf16 %v161_v41, %v160_v42 }
  0xdc   :  { %v1821_v18 = vmul.f32 %v1350_v16, %v135_v10  ;;  %v123_v19 = vpop.f32.mrb[3].mxu0  ;;  %v155_v26 = vmul.f32 %v1350_v16, %v139_v23  ;;  %v159_v36 = vmul.f32 %v1350_v16, %v143_v34  ;;  %v163_v46 = vmul.f32 %v1350_v16, %v147_v44  ;;  %v366_v16 = vld [vmem:[%s2198_s2 + $0x40] sm:$0xff]  ;;  %v369_v23 = vld [vmem:[%s2198_s2 + $0x58] sm:$0xff] }
  0xdd   :  { %v1823_v20 = vmul.f32 %v134_v12, %v123_v19  ;;  %1515 = vmatprep.subr.msk.bf16.mxu1 %vm1809_vm2, %v1513_v17  ;;  %1562 = vmatprep.subr.bf16.mxu0 %v1513_v17  ;;  %v154_v27 = vmul.f32 %v138_v24, %v123_v19  ;;  %v158_v37 = vmul.f32 %v142_v35, %v123_v19  ;;  %v368_v24 = vld [vmem:[%s2198_s2 + $0x50] sm:$0xff] }
  0xde   :  { %1518 = vmatpush3.bf16.xpose.msk.msra.mxu1 %vm1809_vm2, %v1513_v17  ;;  %1564 = vmatpush3.bf16.msra.mxu0 %v1513_v17  ;;  %v162_v47 = vmul.f32 %v146_v45, %v123_v19 }
  0xdf   :  { %v1519_v25 = vpack.c.bf16 %v1821_v18, %v1823_v20  ;;  %v1531_v33 = vpack.c.bf16 %v155_v26, %v154_v27  ;;  %v1543_v43 = vpack.c.bf16 %v159_v36, %v158_v37 }
  0xe0   :  { %v1555_v49 = vpack.c.bf16 %v163_v46, %v162_v47 }
  0xe1   :  { %1566 = vmatprep.subr.bf16.mxu0 %v1519_v25  ;;  %1521 = vmatprep.subr.msk.bf16.mxu1 %vm1809_vm2, %v1519_v25 }
  0xe2   :  { %1568 = vmatpush3.bf16.msra.mxu0 %v1519_v25 }
  0xe3   :  { %1570 = vmatprep.subr.bf16.mxu0 %v1525_v28 }
  0xe6   :  { %1524 = vmatpush3.bf16.xpose.msk.msra.mxu1 %vm1809_vm2, %v1519_v25  ;;  %1572 = vmatpush3.bf16.msra.mxu0 %v1525_v28 }
  0xe7   :  { %1527 = vmatprep.subr.msk.bf16.mxu1 %vm1809_vm2, %v1525_v28  ;;  %1574 = vmatprep.subr.bf16.mxu0 %v1531_v33 }
  0xea   :  { %1576 = vmatpush3.bf16.msra.mxu0 %v1531_v33 }
  0xeb   :  { %1578 = vmatprep.subr.bf16.mxu0 %v1537_v38 }
  0xee   :  { %1530 = vmatpush3.bf16.xpose.msk.msra.mxu1 %vm1809_vm2, %v1525_v28  ;;  %1580 = vmatpush3.bf16.msra.mxu0 %v1537_v38 }
  0xef   :  { %1533 = vmatprep.subr.msk.bf16.mxu1 %vm1809_vm2, %v1531_v33  ;;  %1582 = vmatprep.subr.bf16.mxu0 %v1543_v43 }
  0xf2   :  { %1584 = vmatpush3.bf16.msra.mxu0 %v1543_v43 }
  0xf3   :  { %1586 = vmatprep.subr.bf16.mxu0 %v1549_v48 }
  0xf6   :  { %1536 = vmatpush3.bf16.xpose.msk.msra.mxu1 %vm1809_vm2, %v1531_v33  ;;  %1588 = vmatpush3.bf16.msra.mxu0 %v1549_v48 }
  0xf7   :  { %1539 = vmatprep.subr.msk.bf16.mxu1 %vm1809_vm2, %v1537_v38  ;;  %1590 = vmatprep.subr.bf16.mxu0 %v1555_v49 }
  0xfa   :  { %1592 = vmatpush3.bf16.msra.mxu0 %v1555_v49 }
  0xfe   :  { %1542 = vmatpush3.bf16.xpose.msk.msra.mxu1 %vm1809_vm2, %v1537_v38 }
  0xff   :  { %1545 = vmatprep.subr.msk.bf16.mxu1 %vm1809_vm2, %v1543_v43 }
 0x106   :  { %1548 = vmatpush3.bf16.xpose.msk.msra.mxu1 %vm1809_vm2, %v1543_v43 }
 0x107   :  { %1551 = vmatprep.subr.msk.bf16.mxu1 %vm1809_vm2, %v1549_v48 }
 0x10e   :  { %1554 = vmatpush3.bf16.xpose.msk.msra.mxu1 %vm1809_vm2, %v1549_v48 }
 0x10f   :  { %1557 = vmatprep.subr.msk.bf16.mxu1 %vm1809_vm2, %v1555_v49 }
 0x116   :  { %1560 = vmatpush3.bf16.xpose.msk.msra.mxu1 %vm1809_vm2, %v1555_v49 }
 0x11d   :  { %1384 = vmatmul.mubr.msk.f32.vlgmr.msra.gmra.mrb[0].mxu1 %vm164_vm1, %v1799_v9 }
 0x11e   :  { %1386 = vmatprep.mubr.msk.f32.mxu1 %vm164_vm1, %v1823_v20 }
 0x121   :  { %1387 = vmatmul.mubr.msk.f32.gmra.mrb[2].mxu1 %vm164_vm1, %v1821_v18 }
 0x122   :  { %1389 = vmatprep.mubr.msk.f32.mxu1 %vm164_vm1, %v152_v22 }
 0x125   :  { %1390 = vmatmul.mubr.msk.f32.gmra.mrb[4].mxu1 %vm164_vm1, %v1827_v21 }
 0x126   :  { %1392 = vmatprep.mubr.msk.f32.mxu1 %vm164_vm1, %v154_v27 }
 0x129   :  { %1393 = vmatmul.mubr.msk.f32.gmra.mrb[6].mxu1 %vm164_vm1, %v155_v26 }
 0x12a   :  { %1395 = vmatprep.mubr.msk.f32.mxu1 %vm164_vm1, %v156_v32  ;;  %v370_v32 = vld [vmem:[%s2198_s2 + $0x60] sm:$0xff] }
 0x12d   :  { %1396 = vmatmul.mubr.msk.f32.gmra.mrb[8].mxu1 %vm164_vm1, %v157_v31  ;;  %v371_v31 = vld [vmem:[%s2198_s2 + $0x68] sm:$0xff] }
 0x12e   :  { %1398 = vmatprep.mubr.msk.f32.mxu1 %vm164_vm1, %v158_v37 }
 0x131   :  { %1399 = vmatmul.mubr.msk.f32.gmra.mrb[10].mxu1 %vm164_vm1, %v159_v36 }
 0x132   :  { %1401 = vmatprep.mubr.msk.f32.mxu1 %vm164_vm1, %v160_v42 }
 0x135   :  { %1402 = vmatmul.mubr.msk.f32.gmra.mrb[12].mxu1 %vm164_vm1, %v161_v41 }
 0x136   :  { %1404 = vmatprep.mubr.msk.f32.mxu1 %vm164_vm1, %v162_v47 }
 0x139   :  { %1405 = vmatmul.mubr.msk.f32.gmra.mrb[14].mxu1 %vm164_vm1, %v163_v46 }
 0x1f0   :  { %v1385_v52 = vpop.f32.mrb[0].mxu1 }
 0x1f1   :  { %v279_v53 = vpop.f32.mrb[1].mxu1  ;;  %v375_v54 = vmul.f32 %v1385_v52, %v359_v50 }
 0x1f2   :  { %v374_v55 = vmul.f32 %v358_v51, %v279_v53 }
 0x1f3   :  { %vm391_vm4 = vcmp.eq.f32.partialorder %v375_v54, 0.0 }
 0x1f4   :  { %v1388_v58 = vpop.f32.mrb[2].mxu1  ;;  %vm390_vm3 = vcmp.eq.f32.partialorder %v374_v55, 0.0  ;;  %v1932_v3 = vsel %vm391_vm4, -1e+16, %v375_v54 }
 0x1f5   :  { %v289_v59 = vpop.f32.mrb[3].mxu1  ;;  %v1923_v60 = vsel %vm390_vm3, -1e+16, %v374_v55  ;;  %v377_v61 = vmul.f32 %v1388_v58, %v361_v56 }
 0x1f6   :  { %v376_v62 = vmul.f32 %v360_v57, %v289_v59  ;;  %422 = vmax.xlane.f32.xlu0 %v1923_v60 }
 0x1f7   :  { %vm393_vm6 = vcmp.eq.f32.partialorder %v377_v61, 0.0 }
 0x1f8   :  { %v1391_v1 = vpop.f32.mrb[4].mxu1  ;;  %vm392_vm5 = vcmp.eq.f32.partialorder %v376_v62, 0.0  ;;  %v1944_v11 = vsel %vm393_vm6, -1e+16, %v377_v61 }
 0x1f9   :  { %v299_v2 = vpop.f32.mrb[5].mxu1  ;;  %v1934_v4 = vsel %vm392_vm5, -1e+16, %v376_v62  ;;  %v379_v5 = vmul.f32 %v1391_v1, %v363_v63 }
 0x1fa   :  { %v378_v6 = vmul.f32 %v362_v0, %v299_v2  ;;  %424 = vmax.xlane.f32.xlu0 %v1932_v3  ;;  %426 = vmax.xlane.f32.xlu1 %v1934_v4 }
 0x1fb   :  { %vm395_vm8 = vcmp.eq.f32.partialorder %v379_v5, 0.0 }
 0x1fc   :  { %v1394_v9 = vpop.f32.mrb[6].mxu1  ;;  %vm394_vm7 = vcmp.eq.f32.partialorder %v378_v6, 0.0  ;;  %v1956_v19 = vsel %vm395_vm8, -1e+16, %v379_v5  ;;  %vm851_vm8 = vcmask 56320  }
 0x1fd   :  { %v309_v10 = vpop.f32.mrb[7].mxu1  ;;  %v1946_v12 = vsel %vm394_vm7, -1e+16, %v378_v6  ;;  %v381_v13 = vmul.f32 %v1394_v9, %v365_v7 }
 0x1fe   :  { %v380_v14 = vmul.f32 %v364_v8, %v309_v10  ;;  %428 = vmax.xlane.f32.xlu1 %v1944_v11  ;;  %430 = vmax.xlane.f32.xlu0 %v1946_v12 }
 0x1ff   :  { %vm397_vm10 = vcmp.eq.f32.partialorder %v381_v13, 0.0 }
 0x200   :  { %v1397_v17 = vpop.f32.mrb[8].mxu1  ;;  %vm396_vm9 = vcmp.eq.f32.partialorder %v380_v14, 0.0  ;;  %v1968_v27 = vsel %vm397_vm10, -1e+16, %v381_v13 }
 0x201   :  { %v319_v18 = vpop.f32.mrb[9].mxu1  ;;  %v1958_v20 = vsel %vm396_vm9, -1e+16, %v380_v14  ;;  %v383_v21 = vmul.f32 %v1397_v17, %v367_v15  ;;  %vm1610_vm9 = vmpackc.low %vm851_vm8, %vm851_vm8 }
 0x202   :  { %v382_v22 = vmul.f32 %v366_v16, %v319_v18  ;;  %432 = vmax.xlane.f32.xlu1 %v1956_v19  ;;  %434 = vmax.xlane.f32.xlu0 %v1958_v20 }
 0x203   :  { %vm399_vm12 = vcmp.eq.f32.partialorder %v383_v21, 0.0 }
 0x204   :  { %v1400_v25 = vpop.f32.mrb[10].mxu1  ;;  %vm398_vm11 = vcmp.eq.f32.partialorder %v382_v22, 0.0  ;;  %v1980_v35 = vsel %vm399_vm12, -1e+16, %v383_v21 }
 0x205   :  { %v329_v26 = vpop.f32.mrb[11].mxu1  ;;  %v1970_v28 = vsel %vm398_vm11, -1e+16, %v382_v22  ;;  %v385_v29 = vmul.f32 %v1400_v25, %v369_v23 }
 0x206   :  { %v384_v30 = vmul.f32 %v368_v24, %v329_v26  ;;  %436 = vmax.xlane.f32.xlu1 %v1968_v27  ;;  %438 = vmax.xlane.f32.xlu0 %v1970_v28 }
 0x207   :  { %vm401_vm14 = vcmp.eq.f32.partialorder %v385_v29, 0.0 }
 0x208   :  { %v1403_v33 = vpop.f32.mrb[12].mxu1  ;;  %vm400_vm13 = vcmp.eq.f32.partialorder %v384_v30, 0.0  ;;  %v1992_v43 = vsel %vm401_vm14, -1e+16, %v385_v29 }
 0x209   :  { %v339_v34 = vpop.f32.mrb[13].mxu1  ;;  %v1982_v36 = vsel %vm400_vm13, -1e+16, %v384_v30  ;;  %v387_v37 = vmul.f32 %v1403_v33, %v371_v31 }
 0x20a   :  { %v386_v38 = vmul.f32 %v370_v32, %v339_v34  ;;  %440 = vmax.xlane.f32.xlu1 %v1980_v35  ;;  %442 = vmax.xlane.f32.xlu0 %v1982_v36 }
 0x20b   :  { %vm403_vm0 = vcmp.eq.f32.partialorder %v387_v37, 0.0 }
 0x20c   :  { %v1406_v41 = vpop.f32.mrb[14].mxu1  ;;  %vm402_vm15 = vcmp.eq.f32.partialorder %v386_v38, 0.0  ;;  %v1998_v47 = vsel %vm403_vm0, -1e+16, %v387_v37 }
 0x20d   :  { %v349_v42 = vpop.f32.mrb[15].mxu1  ;;  %v1994_v44 = vsel %vm402_vm15, -1e+16, %v386_v38  ;;  %v389_v45 = vmul.f32 %v1406_v41, %v373_v39 }
 0x20e   :  { %v388_v46 = vmul.f32 %v372_v40, %v349_v42  ;;  %444 = vmax.xlane.f32.xlu1 %v1992_v43  ;;  %446 = vmax.xlane.f32.xlu0 %v1994_v44 }
 0x20f   :  { %vm405_vm3 = vcmp.eq.f32.partialorder %v389_v45, 0.0 }
 0x210   :  { %vm404_vm2 = vcmp.eq.f32.partialorder %v388_v46, 0.0  ;;  %v2004_v49 = vsel %vm405_vm3, -1e+16, %v389_v45 }
 0x211   :  { %v2000_v48 = vsel %vm404_vm2, -1e+16, %v388_v46 }
 0x212   :  { %448 = vmax.xlane.f32.xlu1 %v1998_v47  ;;  %450 = vmax.xlane.f32.xlu0 %v2000_v48 }
 0x216   :  { %452 = vmax.xlane.f32.xlu1 %v2004_v49 }
 0x283   :  { %v423_v50 = vpop.xlane.xlu0 %422 }
 0x284   :  { %v454_v51 = vsub.f32 %v1923_v60, %v423_v50  ;;  %v746_v50 = vld [vmem:[%s2199_s6] sm:$0xff] }
 0x286   :  { %v470_v52 = vmul.f32 1.442695, %v454_v51  ;;  %v747_v51 = vld [vmem:[%s2199_s6 + $0x8] sm:$0xff] }
 0x287   :  { %v425_v53 = vpop.xlane.xlu0 %424  ;;  %v427_v54 = vpop.xlane.xlu1 %426 }
 0x288   :  { %1641 = vpow2.f32 %v470_v52  ;;  %v455_v55 = vsub.f32 %v1932_v3, %v425_v53  ;;  %v456_v56 = vsub.f32 %v1934_v4, %v427_v54  ;;  %v1593_v52 = vpack.c.bf16 %v747_v51, %v746_v50 }
 0x28a   :  { %v472_v57 = vmul.f32 1.442695, %v455_v55  ;;  %v474_v58 = vmul.f32 1.442695, %v456_v56  ;;  %1594 = vmatprep.subr.bf16.mxu0 %v1593_v52 }
 0x28b   :  { %v429_v59 = vpop.xlane.xlu1 %428  ;;  %v431_v61 = vpop.xlane.xlu0 %430 }
 0x28c   :  { %1643 = vpow2.f32 %v472_v57  ;;  %v457_v62 = vsub.f32 %v1944_v11, %v429_v59  ;;  %v458_v63 = vsub.f32 %v1946_v12, %v431_v61 }
 0x28d   :  { %1645 = vpow2.f32 %v474_v58 }
 0x28e   :  { %v476_v0 = vmul.f32 1.442695, %v457_v62  ;;  %v478_v60 = vmul.f32 1.442695, %v458_v63  ;;  %v748_v63 = vld [vmem:[%s2199_s6 + $0x10] sm:$0xff] }
 0x28f   :  { %v433_v1 = vpop.xlane.xlu1 %432  ;;  %v435_v2 = vpop.xlane.xlu0 %434 }
 0x290   :  { %1647 = vpow2.f32 %v476_v0  ;;  %v459_v5 = vsub.f32 %v1956_v19, %v433_v1  ;;  %v460_v3 = vsub.f32 %v1958_v20, %v435_v2  ;;  %v749_v0 = vld [vmem:[%s2199_s6 + $0x18] sm:$0xff] }
 0x291   :  { %1649 = vpow2.f32 %v478_v60 }
 0x292   :  { %v2014_v4 = vpop.eup %1641  ;;  %v480_v6 = vmul.f32 1.442695, %v459_v5  ;;  %v482_v7 = vmul.f32 1.442695, %v460_v3  ;;  %v1597_v3 = vpack.c.bf16 %v749_v0, %v748_v63 }
 0x293   :  { %v437_v8 = vpop.xlane.xlu1 %436  ;;  %v439_v9 = vpop.xlane.xlu0 %438  ;;  %502 = vadd.xlane.f32.xlu0 %v2014_v4 }
 0x294   :  { %1651 = vpow2.f32 %v480_v6  ;;  %v461_v10 = vsub.f32 %v1968_v27, %v437_v8  ;;  %v462_v11 = vsub.f32 %v1970_v28, %v439_v9  ;;  %v751_v8 = vld [vmem:[%s2199_s6 + $0x28] sm:$0xff] }
 0x295   :  { %1653 = vpow2.f32 %v482_v7  ;;  %v750_v7 = vld [vmem:[%s2199_s6 + $0x20] sm:$0xff] }
 0x296   :  { %v2019_v12 = vpop.eup %1643  ;;  %v484_v13 = vmul.f32 1.442695, %v461_v10  ;;  %v486_v14 = vmul.f32 1.442695, %v462_v11 }
 0x297   :  { %v2021_v15 = vpop.eup %1645  ;;  %v441_v16 = vpop.xlane.xlu1 %440  ;;  %504 = vadd.xlane.f32.xlu1 %v2019_v12 }
 0x298   :  { %v443_v17 = vpop.xlane.xlu0 %442  ;;  %1655 = vpow2.f32 %v484_v13  ;;  %v463_v18 = vsub.f32 %v1980_v35, %v441_v16  ;;  %506 = vadd.xlane.f32.xlu0 %v2021_v15  ;;  %v1601_v13 = vpack.c.bf16 %v751_v8, %v750_v7  ;;  %v752_v16 = vld [vmem:[%s2199_s6 + $0x30] sm:$0xff] }
 0x299   :  { %v464_v19 = vsub.f32 %v1982_v36, %v443_v17  ;;  %1657 = vpow2.f32 %v486_v14  ;;  %v753_v17 = vld [vmem:[%s2199_s6 + $0x38] sm:$0xff] }
 0x29a   :  { %v2027_v20 = vpop.eup %1647  ;;  %v488_v21 = vmul.f32 1.442695, %v463_v18 }
 0x29b   :  { %v490_v22 = vmul.f32 1.442695, %v464_v19  ;;  %v2029_v23 = vpop.eup %1649  ;;  %v445_v24 = vpop.xlane.xlu1 %444  ;;  %508 = vadd.xlane.f32.xlu1 %v2027_v20 }
 0x29c   :  { %v447_v25 = vpop.xlane.xlu0 %446  ;;  %1659 = vpow2.f32 %v488_v21  ;;  %v465_v26 = vsub.f32 %v1992_v43, %v445_v24  ;;  %510 = vadd.xlane.f32.xlu0 %v2029_v23 }
 0x29d   :  { %v466_v27 = vsub.f32 %v1994_v44, %v447_v25  ;;  %1661 = vpow2.f32 %v490_v22  ;;  %v1605_v22 = vpack.c.bf16 %v753_v17, %v752_v16 }
 0x29e   :  { %v2035_v28 = vpop.eup %1651  ;;  %v492_v29 = vmul.f32 1.442695, %v465_v26 }
 0x29f   :  { %v494_v30 = vmul.f32 1.442695, %v466_v27  ;;  %v2037_v31 = vpop.eup %1653  ;;  %v449_v32 = vpop.xlane.xlu1 %448  ;;  %512 = vadd.xlane.f32.xlu1 %v2035_v28 }
 0x2a0   :  { %v451_v33 = vpop.xlane.xlu0 %450  ;;  %1663 = vpow2.f32 %v492_v29  ;;  %v467_v34 = vsub.f32 %v1998_v47, %v449_v32  ;;  %514 = vadd.xlane.f32.xlu0 %v2037_v31 }
 0x2a1   :  { %v468_v35 = vsub.f32 %v2000_v48, %v451_v33  ;;  %1665 = vpow2.f32 %v494_v30 }
 0x2a2   :  { %v2043_v36 = vpop.eup %1655  ;;  %v496_v37 = vmul.f32 1.442695, %v467_v34 }
 0x2a3   :  { %v498_v38 = vmul.f32 1.442695, %v468_v35  ;;  %v2045_v39 = vpop.eup %1657  ;;  %516 = vadd.xlane.f32.xlu1 %v2043_v36  ;;  %v453_v40 = vpop.xlane.xlu1 %452 }
 0x2a4   :  { %1667 = vpow2.f32 %v496_v37  ;;  %v469_v41 = vsub.f32 %v2004_v49, %v453_v40  ;;  %518 = vadd.xlane.f32.xlu0 %v2045_v39 }
 0x2a5   :  { %1669 = vpow2.f32 %v498_v38 }
 0x2a6   :  { %v2050_v42 = vpop.eup %1659  ;;  %v500_v43 = vmul.f32 1.442695, %v469_v41 }
 0x2a7   :  { %v2052_v44 = vpop.eup %1661  ;;  %520 = vadd.xlane.f32.xlu1 %v2050_v42 }
 0x2a8   :  { %1671 = vpow2.f32 %v500_v43  ;;  %522 = vadd.xlane.f32.xlu0 %v2052_v44 }
 0x2aa   :  { %v2056_v45 = vpop.eup %1663 }
 0x2ab   :  { %v2058_v46 = vpop.eup %1665  ;;  %524 = vadd.xlane.f32.xlu1 %v2056_v45 }
 0x2ac   :  { %526 = vadd.xlane.f32.xlu0 %v2058_v46 }
 0x2ae   :  { %v2062_v47 = vpop.eup %1667 }
 0x2af   :  { %v2064_v48 = vpop.eup %1669  ;;  %528 = vadd.xlane.f32.xlu1 %v2062_v47 }
 0x2b0   :  { %530 = vadd.xlane.f32.xlu0 %v2064_v48 }
 0x2b2   :  { %v2068_v49 = vpop.eup %1671 }
 0x2b3   :  { %532 = vadd.xlane.f32.xlu1 %v2068_v49 }
 0x320   :  { %v503_v53 = vpop.xlane.xlu0 %502 }
 0x321   :  { %1673 = vrcp.f32 %v503_v53 }
 0x324   :  { %v505_v54 = vpop.xlane.xlu1 %504 }
 0x325   :  { %1675 = vrcp.f32 %v505_v54  ;;  %v507_v55 = vpop.xlane.xlu0 %506 }
 0x326   :  { %1677 = vrcp.f32 %v507_v55 }
 0x328   :  { %v509_v56 = vpop.xlane.xlu1 %508 }
 0x329   :  { %1679 = vrcp.f32 %v509_v56  ;;  %v511_v57 = vpop.xlane.xlu0 %510 }
 0x32a   :  { %1681 = vrcp.f32 %v511_v57 }
 0x32b   :  { %v1674_v58 = vpop.eup %1673 }
 0x32c   :  { %v513_v59 = vpop.xlane.xlu1 %512  ;;  %v535_v61 = vmul.f32 %v1674_v58, %v2014_v4 }
 0x32d   :  { %1683 = vrcp.f32 %v513_v59  ;;  %v515_v62 = vpop.xlane.xlu0 %514 }
 0x32e   :  { %1685 = vrcp.f32 %v515_v62  ;;  %1439 = vmatprep.mubr.f32.mxu0 %v535_v61 }
 0x32f   :  { %v1676_v60 = vpop.eup %1675 }
 0x330   :  { %v1678_v1 = vpop.eup %1677  ;;  %v537_v2 = vmul.f32 %v1676_v60, %v2019_v12  ;;  %v517_v5 = vpop.xlane.xlu1 %516 }
 0x331   :  { %1687 = vrcp.f32 %v517_v5  ;;  %v519_v4 = vpop.xlane.xlu0 %518  ;;  %v539_v6 = vmul.f32 %v1678_v1, %v2021_v15 }
 0x332   :  { %1689 = vrcp.f32 %v519_v4  ;;  %1440 = vmatmul.mubr.f32.vlgmr.msra.gmra.mrb[4].mxu0 %v537_v2  ;;  %v950_v4 = vld [vmem:[%s2201_s3 + $0x8] sm:$0xff] }
 0x333   :  { %v1680_v9 = vpop.eup %1679  ;;  %1442 = vmatprep.mubr.f32.mxu0 %v539_v6  ;;  %1596 = vmatpush3.bf16.msra.mxu0 %v1593_v52  ;;  %v949_v6 = vld [vmem:[%s2201_s3] sm:$0xff] }
 0x334   :  { %v1682_v10 = vpop.eup %1681  ;;  %v521_v11 = vpop.xlane.xlu1 %520  ;;  %v541_v12 = vmul.f32 %v1680_v9, %v2027_v20  ;;  %1598 = vmatprep.subr.bf16.mxu0 %v1597_v3 }
 0x335   :  { %1691 = vrcp.f32 %v521_v11  ;;  %v523_v14 = vpop.xlane.xlu0 %522  ;;  %v543_v15 = vmul.f32 %v1682_v10, %v2029_v23  ;;  %v952_v11 = vld [vmem:[%s2201_s3 + $0x18] sm:$0xff] }
 0x336   :  { %1693 = vrcp.f32 %v523_v14  ;;  %1443 = vmatmul.mubr.f32.gmra.mrb[6].mxu0 %v541_v12  ;;  %v951_v12 = vld [vmem:[%s2201_s3 + $0x10] sm:$0xff] }
 0x337   :  { %v1684_v18 = vpop.eup %1683  ;;  %1445 = vmatprep.mubr.f32.mxu0 %v543_v15  ;;  %1600 = vmatpush3.bf16.msra.mxu0 %v1597_v3 }
 0x338   :  { %v1686_v19 = vpop.eup %1685  ;;  %v525_v20 = vpop.xlane.xlu1 %524  ;;  %v545_v21 = vmul.f32 %v1684_v18, %v2035_v28  ;;  %1602 = vmatprep.subr.bf16.mxu0 %v1601_v13 }
 0x339   :  { %1695 = vrcp.f32 %v525_v20  ;;  %v527_v23 = vpop.xlane.xlu0 %526  ;;  %v547_v24 = vmul.f32 %v1686_v19, %v2037_v31 }
 0x33a   :  { %1697 = vrcp.f32 %v527_v23  ;;  %1446 = vmatmul.mubr.f32.gmra.mrb[4].mxu0 %v545_v21 }
 0x33b   :  { %v1688_v25 = vpop.eup %1687  ;;  %1448 = vmatprep.mubr.f32.mxu0 %v547_v24  ;;  %1604 = vmatpush3.bf16.msra.mxu0 %v1601_v13 }
 0x33c   :  { %v1690_v26 = vpop.eup %1689  ;;  %v529_v27 = vpop.xlane.xlu1 %528  ;;  %v549_v29 = vmul.f32 %v1688_v25, %v2043_v36  ;;  %1606 = vmatprep.subr.bf16.mxu0 %v1605_v22 }
 0x33d   :  { %1699 = vrcp.f32 %v529_v27  ;;  %v531_v30 = vpop.xlane.xlu0 %530  ;;  %v551_v28 = vmul.f32 %v1690_v26, %v2045_v39 }
 0x33e   :  { %1701 = vrcp.f32 %v531_v30  ;;  %1449 = vmatmul.mubr.f32.gmra.mrb[6].mxu0 %v549_v29 }
 0x33f   :  { %v1692_v32 = vpop.eup %1691  ;;  %1451 = vmatprep.mubr.f32.mxu0 %v551_v28  ;;  %1608 = vmatpush3.bf16.msra.mxu0 %v1605_v22 }
 0x340   :  { %v1694_v31 = vpop.eup %1693  ;;  %v533_v33 = vpop.xlane.xlu1 %532  ;;  %v553_v34 = vmul.f32 %v1692_v32, %v2050_v42 }
 0x341   :  { %1703 = vrcp.f32 %v533_v33  ;;  %v555_v35 = vmul.f32 %v1694_v31, %v2052_v44 }
 0x342   :  { %1452 = vmatmul.mubr.f32.gmra.mrb[4].mxu0 %v553_v34 }
 0x343   :  { %v1696_v37 = vpop.eup %1695  ;;  %1454 = vmatprep.mubr.f32.mxu0 %v555_v35 }
 0x344   :  { %v1698_v36 = vpop.eup %1697  ;;  %v557_v38 = vmul.f32 %v1696_v37, %v2056_v45  ;;  %v1228_v45 = vld [vmem:[%s2200_s5] ss:$0 sm:$0xff] }
 0x345   :  { %v559_v39 = vmul.f32 %v1698_v36, %v2058_v46 }
 0x346   :  { %1455 = vmatmul.mubr.f32.gmra.mrb[6].mxu0 %v557_v38 }
 0x347   :  { %v1700_v40 = vpop.eup %1699  ;;  %1457 = vmatprep.mubr.f32.mxu0 %v559_v39 }
 0x348   :  { %v1702_v41 = vpop.eup %1701  ;;  %v561_v43 = vmul.f32 %v1700_v40, %v2062_v47 }
 0x349   :  { %v563_v50 = vmul.f32 %v1702_v41, %v2064_v48 }
 0x34a   :  { %1458 = vmatmul.mubr.f32.gmra.mrb[4].mxu0 %v561_v43 }
 0x34b   :  { %v1704_v42 = vpop.eup %1703  ;;  %1460 = vmatprep.mubr.f32.mxu0 %v563_v50 }
 0x34c   :  { %v565_v44 = vmul.f32 %v1704_v42, %v2068_v49 }
 0x34e   :  { %1461 = vmatmul.mubr.f32.gmra.mrb[6].mxu0 %v565_v44 }
 0x41d   :  { %v1459_v51 = vpop.f32.mrb[4].mxu0 }
 0x41e   :  { %v731_v46 = vadd.f32 %v1459_v51, %v1228_v45  ;;  %v692_v52 = vpop.f32.mrb[5].mxu0 }
 0x41f   :  { %v730_v53 = vadd.f32 %v1228_v45, %v692_v52 }
 0x420   :  { %v739_v54 = vmul.f32 0.01, %v731_v46  ;;  %vm735_vm4 = vcmp.ge.f32.partialorder %v731_v46, 0.0 }
 0x421   :  { %vm734_vm5 = vcmp.ge.f32.partialorder %v730_v53, 0.0  ;;  %v738_v47 = vmul.f32 0.01, %v730_v53  ;;  %v1462_v55 = vpop.f32.mrb[6].mxu0 }
 0x422   :  { %v733_v48 = vadd.f32 %v1462_v55, %v1228_v45  ;;  %v702_v56 = vpop.f32.mrb[7].mxu0  ;;  %v743_v59 = vsel %vm735_vm4, %v731_v46, %v739_v54 }
 0x423   :  { %v732_v57 = vadd.f32 %v1228_v45, %v702_v56  ;;  %v742_v58 = vsel %vm734_vm5, %v730_v53, %v738_v47 }
 0x424   :  { %v741_v49 = vmul.f32 0.01, %v733_v48  ;;  %1479 = vmatprep.mubr.msk.f32.mxu0 %vm164_vm1, %v742_v58  ;;  %vm737_vm6 = vcmp.ge.f32.partialorder %v733_v48, 0.0  ;;  %v1241_v58 = vld [vmem:[%s2202_s7] ss:$0 sm:$0xff] }
 0x425   :  { %vm736_vm7 = vcmp.ge.f32.partialorder %v732_v57, 0.0  ;;  %v740_v61 = vmul.f32 0.01, %v732_v57  ;;  %1480 = vmatmul.mubr.msk.f32.vlgmr.msra.gmra.mrb[8].mxu0 %vm164_vm1, %v743_v59 }
 0x426   :  { %v745_v63 = vsel %vm737_vm6, %v733_v48, %v741_v49 }
 0x427   :  { %v744_v62 = vsel %vm736_vm7, %v732_v57, %v740_v61 }
 0x428   :  { %1482 = vmatprep.mubr.msk.f32.mxu0 %vm164_vm1, %v744_v62 }
 0x429   :  { %1483 = vmatmul.mubr.msk.f32.gmra.mrb[10].mxu0 %vm164_vm1, %v745_v63  ;;  %vm965_vm1 = vcmask 261120  }
 0x4f8   :  { %v1481_v0 = vpop.f32.mrb[8].mxu0 }
 0x4f9   :  { %v832_v60 = vpop.f32.mrb[9].mxu0 }
 0x4fa   :  { %v1609_v1 = vpack.c.bf16 %v1481_v0, %v832_v60  ;;  %1493 = vmatprep.mubr.msk.f32.mxu0 %vm851_vm8, %v832_v60 }
 0x4fc   :  { %v1484_v2 = vpop.f32.mrb[10].mxu0  ;;  %1611 = vmatprep.subr.msk.bf16.mxu0 %vm1610_vm9, %v1609_v1 }
 0x4fd   :  { %v842_v5 = vpop.f32.mrb[11].mxu0  ;;  %1614 = vmatpush3.bf16.xpose.msk.msra.mxu0 %vm1610_vm9, %v1609_v1 }
 0x4fe   :  { %v1615_v3 = vpack.c.bf16 %v1484_v2, %v842_v5 }
 0x500   :  { %1617 = vmatprep.subr.msk.bf16.mxu0 %vm1610_vm9, %v1615_v3 }
 0x505   :  { %1620 = vmatpush3.bf16.xpose.msk.msra.mxu0 %vm1610_vm9, %v1615_v3 }
 0x506   :  { %1622 = vmatprep.subr.bf16.mxu0 %v1609_v1 }
 0x50c   :  { %1494 = vmatmul.mubr.msk.f32.vlgmr.msra.gmra.mrb[12].mxu0 %vm851_vm8, %v1481_v0 }
 0x50d   :  { %1496 = vmatprep.mubr.msk.f32.mxu0 %vm851_vm8, %v842_v5  ;;  %1624 = vmatpush3.bf16.msra.mxu0 %v1609_v1 }
 0x50e   :  { %1626 = vmatprep.subr.bf16.mxu0 %v1615_v3 }
 0x510   :  { %1497 = vmatmul.mubr.msk.f32.gmra.mrb[14].mxu0 %vm851_vm8, %v1484_v2 }
 0x511   :  { %1628 = vmatpush3.bf16.msra.mxu0 %v1615_v3 }
 0x5df   :  { %v1495_v7 = vpop.f32.mrb[12].mxu0 }
 0x5e0   :  { %v954_v8 = vmul.f32 %v1495_v7, %v950_v4  ;;  %v930_v9 = vpop.f32.mrb[13].mxu0 }
 0x5e1   :  { %v953_v10 = vmul.f32 %v949_v6, %v930_v9 }
 0x5e2   :  { %vm958_vm10 = vcmp.eq.f32.partialorder %v954_v8, 0.0 }
 0x5e3   :  { %v1498_v13 = vpop.f32.mrb[14].mxu0  ;;  %v962_v14 = vsel %vm958_vm10, -1e+16, %v954_v8  ;;  %vm957_vm11 = vcmp.eq.f32.partialorder %v953_v10, 0.0 }
 0x5e4   :  { %v956_v15 = vmul.f32 %v1498_v13, %v952_v11  ;;  %v940_v16 = vpop.f32.mrb[15].mxu0  ;;  %v969_v17 = vsel %vm965_vm1, %v962_v14, -inf  ;;  %v961_v18 = vsel %vm957_vm11, -1e+16, %v953_v10 }
 0x5e5   :  { %v955_v19 = vmul.f32 %v951_v12, %v940_v16  ;;  %970 = vmax.xlane.f32.xlu1 %v969_v17  ;;  %v966_v20 = vsel %vm965_vm1, %v961_v18, -inf }
 0x5e6   :  { %967 = vmax.xlane.f32.xlu0 %v966_v20  ;;  %vm960_vm12 = vcmp.eq.f32.partialorder %v956_v15, 0.0 }
 0x5e7   :  { %v964_v21 = vsel %vm960_vm12, -1e+16, %v956_v15  ;;  %vm959_vm13 = vcmp.eq.f32.partialorder %v955_v19, 0.0 }
 0x5e8   :  { %v975_v22 = vsel %vm965_vm1, %v964_v21, -inf  ;;  %v963_v23 = vsel %vm959_vm13, -1e+16, %v955_v19 }
 0x5e9   :  { %976 = vmax.xlane.f32.xlu1 %v975_v22  ;;  %v972_v24 = vsel %vm965_vm1, %v963_v23, -inf }
 0x5ea   :  { %973 = vmax.xlane.f32.xlu0 %v972_v24 }
 0x672   :  { %v971_v25 = vpop.xlane.xlu1 %970 }
 0x673   :  { %v979_v26 = vsub.f32 %v962_v14, %v971_v25  ;;  %v968_v27 = vpop.xlane.xlu0 %967 }
 0x674   :  { %v978_v29 = vsub.f32 %v961_v18, %v968_v27 }
 0x675   :  { %v984_v30 = vmul.f32 1.442695, %v979_v26 }
 0x676   :  { %v982_v28 = vmul.f32 1.442695, %v978_v29  ;;  %v977_v32 = vpop.xlane.xlu1 %976 }
 0x677   :  { %1705 = vpow2.f32 %v984_v30  ;;  %v981_v31 = vsub.f32 %v964_v21, %v977_v32  ;;  %v974_v33 = vpop.xlane.xlu0 %973 }
 0x678   :  { %1707 = vpow2.f32 %v982_v28  ;;  %v980_v34 = vsub.f32 %v963_v23, %v974_v33 }
 0x679   :  { %v988_v35 = vmul.f32 1.442695, %v981_v31 }
 0x67a   :  { %v986_v37 = vmul.f32 1.442695, %v980_v34 }
 0x67b   :  { %1709 = vpow2.f32 %v988_v35 }
 0x67c   :  { %1711 = vpow2.f32 %v986_v37 }
 0x681   :  { %v1706_v36 = vpop.eup %1705 }
 0x682   :  { %v1708_v38 = vpop.eup %1707  ;;  %v993_v39 = vsel %vm965_vm1, %v1706_v36, 0.0 }
 0x683   :  { %994 = vadd.xlane.f32.xlu1 %v993_v39  ;;  %v990_v40 = vsel %vm965_vm1, %v1708_v38, 0.0 }
 0x684   :  { %991 = vadd.xlane.f32.xlu0 %v990_v40 }
 0x685   :  { %v1710_v41 = vpop.eup %1709 }
 0x686   :  { %v1712_v43 = vpop.eup %1711  ;;  %v999_v50 = vsel %vm965_vm1, %v1710_v41, 0.0 }
 0x687   :  { %1000 = vadd.xlane.f32.xlu1 %v999_v50  ;;  %v996_v42 = vsel %vm965_vm1, %v1712_v43, 0.0 }
 0x688   :  { %997 = vadd.xlane.f32.xlu0 %v996_v42 }
 0x710   :  { %v995_v44 = vpop.xlane.xlu1 %994 }
 0x711   :  { %1713 = vrcp.f32 %v995_v44  ;;  %v992_v45 = vpop.xlane.xlu0 %991 }
 0x712   :  { %1715 = vrcp.f32 %v992_v45 }
 0x714   :  { %v1001_v51 = vpop.xlane.xlu1 %1000 }
 0x715   :  { %1717 = vrcp.f32 %v1001_v51  ;;  %v998_v46 = vpop.xlane.xlu0 %997 }
 0x716   :  { %1719 = vrcp.f32 %v998_v46 }
 0x71b   :  { %v1714_v52 = vpop.eup %1713 }
 0x71c   :  { %v1716_v53 = vpop.eup %1715  ;;  %v1005_v47 = vmul.f32 %v1714_v52, %v1706_v36 }
 0x71d   :  { %v1003_v54 = vmul.f32 %v1716_v53, %v1708_v38 }
 0x71f   :  { %v1718_v55 = vpop.eup %1717  ;;  %1507 = vmatprep.mubr.msk.f32.mxu0 %vm965_vm1, %v1003_v54 }
 0x720   :  { %v1720_v48 = vpop.eup %1719  ;;  %1508 = vmatmul.mubr.msk.f32.vlgmr.msra.gmra.mrb[16].mxu0 %vm965_vm1, %v1005_v47  ;;  %v1009_v57 = vmul.f32 %v1718_v55, %v1710_v41 }
 0x721   :  { %v1007_v56 = vmul.f32 %v1720_v48, %v1712_v43 }
 0x723   :  { %1510 = vmatprep.mubr.msk.f32.mxu0 %vm965_vm1, %v1007_v56 }
 0x724   :  { %1511 = vmatmul.mubr.msk.f32.gmra.mrb[18].mxu0 %vm965_vm1, %v1009_v57 }
 0x7f3   :  { %v1509_v59 = vpop.f32.mrb[16].mxu0 }
 0x7f4   :  { %v1101_v49 = vadd.f32 %v1509_v59, %v1241_v58  ;;  %v1095_v61 = vpop.f32.mrb[17].mxu0 }
 0x7f5   :  { %v1096_v62 = vadd.f32 %v1241_v58, %v1095_v61 }
 0x7f6   :  { %vm1115_vm14 = vcmp.ge.f32.partialorder %v1101_v49, 0.0  ;;  %v1119_v63 = vmul.f32 0.01, %v1101_v49 }
 0x7f7   :  { %vm1114_vm15 = vcmp.ge.f32.partialorder %v1096_v62, 0.0  ;;  %v1118_v0 = vmul.f32 0.01, %v1096_v62  ;;  %v1512_v60 = vpop.f32.mrb[18].mxu0 }
 0x7f8   :  { %v2151_v1 = vsel %vm1115_vm14, %v1101_v49, %v1119_v63  ;;  %v1111_v2 = vadd.f32 %v1512_v60, %v1241_v58  ;;  %v1105_v5 = vpop.f32.mrb[19].mxu0 }
 0x7f9   :  { %v1127_v3 = vsel %vm851_vm8, %v2151_v1, -inf  ;;  %v2155_v4 = vsel %vm1114_vm15, %v1096_v62, %v1118_v0  ;;  %v1106_v6 = vadd.f32 %v1241_v58, %v1105_v5 }
 0x7fa   :  { %v1126_v7 = vsel %vm851_vm8, %v2155_v4, -inf  ;;  %vm1117_vm0 = vcmp.ge.f32.partialorder %v1111_v2, 0.0  ;;  %v1121_v8 = vmul.f32 0.01, %v1111_v2 }
 0x7fb   :  { %v1128_v9 = vmax.f32 %v1126_v7, %v1127_v3  ;;  %vm1116_vm2 = vcmp.ge.f32.partialorder %v1106_v6, 0.0  ;;  %v1120_v10 = vmul.f32 0.01, %v1106_v6 }
 0x7fc   :  { %v2159_v11 = vsel %vm1117_vm0, %v1111_v2, %v1121_v8 }
 0x7fd   :  { %v1129_v12 = vrot.slane %v1128_v9, 4  ;;  %v1136_v13 = vsel %vm851_vm8, %v2159_v11, -inf  ;;  %v2163_v14 = vsel %vm1116_vm2, %v1106_v6, %v1120_v10 }
 0x7fe   :  { %v1135_v15 = vsel %vm851_vm8, %v2163_v14, -inf }
 0x7ff   :  { %v1130_v16 = vmax.f32 %v1128_v9, %v1129_v12  ;;  %v1137_v17 = vmax.f32 %v1135_v15, %v1136_v13 }
 0x801   :  { %v1131_v18 = vrot.slane %v1130_v16, 2  ;;  %v1138_v19 = vrot.slane %v1137_v17, 4 }
 0x803   :  { %v1132_v20 = vmax.f32 %v1130_v16, %v1131_v18  ;;  %v1139_v21 = vmax.f32 %v1137_v17, %v1138_v19 }
 0x805   :  { %v1133_v22 = vrot.slane %v1132_v20, 1  ;;  %v1140_v23 = vrot.slane %v1139_v21, 2 }
 0x807   :  { %v1134_v24 = vmax.f32 %v1132_v20, %v1133_v22  ;;  %v1141_v25 = vmax.f32 %v1139_v21, %v1140_v23 }
 0x809   :  { %v1144_v26 = vsub.f32 %v2155_v4, %v1134_v24  ;;  %v1145_v27 = vsub.f32 %v2151_v1, %v1134_v24  ;;  %v1142_v29 = vrot.slane %v1141_v25, 1 }
 0x80b   :  { %v1148_v30 = vmul.f32 1.442695, %v1144_v26  ;;  %v1150_v28 = vmul.f32 1.442695, %v1145_v27  ;;  %v1143_v32 = vmax.f32 %v1141_v25, %v1142_v29 }
 0x80d   :  { %1721 = vpow2.f32 %v1148_v30  ;;  %v1146_v31 = vsub.f32 %v2163_v14, %v1143_v32  ;;  %v1147_v33 = vsub.f32 %v2159_v11, %v1143_v32 }
 0x80e   :  { %1723 = vpow2.f32 %v1150_v28 }
 0x80f   :  { %v1152_v34 = vmul.f32 1.442695, %v1146_v31  ;;  %v1154_v35 = vmul.f32 1.442695, %v1147_v33 }
 0x811   :  { %1725 = vpow2.f32 %v1152_v34 }
 0x812   :  { %1727 = vpow2.f32 %v1154_v35 }
 0x817   :  { %v1722_v37 = vpop.eup %1721 }
 0x818   :  { %v1724_v36 = vpop.eup %1723  ;;  %v1156_v38 = vsel %vm851_vm8, %v1722_v37, 0.0 }
 0x819   :  { %v1157_v39 = vsel %vm851_vm8, %v1724_v36, 0.0 }
 0x81a   :  { %v1158_v40 = vadd.f32 %v1157_v39, %v1156_v38 }
 0x81b   :  { %v1726_v41 = vpop.eup %1725 }
 0x81c   :  { %v1728_v43 = vpop.eup %1727  ;;  %v1159_v50 = vrot.slane %v1158_v40, 4  ;;  %v1165_v42 = vsel %vm851_vm8, %v1726_v41, 0.0 }
 0x81d   :  { %v1166_v44 = vsel %vm851_vm8, %v1728_v43, 0.0 }
 0x81e   :  { %v1160_v45 = vadd.f32 %v1159_v50, %v1158_v40  ;;  %v1167_v51 = vadd.f32 %v1166_v44, %v1165_v42 }
 0x820   :  { %v1161_v46 = vrot.slane %v1160_v45, 2  ;;  %v1168_v52 = vrot.slane %v1167_v51, 4 }
 0x822   :  { %v1162_v53 = vadd.f32 %v1161_v46, %v1160_v45  ;;  %v1169_v54 = vadd.f32 %v1168_v52, %v1167_v51 }
 0x824   :  { %v1163_v47 = vrot.slane %v1162_v53, 1  ;;  %v1170_v55 = vrot.slane %v1169_v54, 2 }
 0x826   :  { %v1164_v48 = vadd.f32 %v1163_v47, %v1162_v53  ;;  %v1171_v56 = vadd.f32 %v1170_v55, %v1169_v54 }
 0x828   :  { %1729 = vlog2.f32 %v1164_v48  ;;  %v1172_v57 = vrot.slane %v1171_v56, 1 }
 0x82a   :  { %v1173_v58 = vadd.f32 %v1172_v57, %v1171_v56 }
 0x82c   :  { %1731 = vlog2.f32 %v1173_v58 }
 0x832   :  { %v1730_v59 = vpop.eup %1729 }
 0x833   :  { %v1175_v49 = vmul.f32 0.6931472, %v1730_v59 }
 0x835   :  { %v1178_v61 = vadd.f32 %v1175_v49, %v1134_v24 }
 0x836   :  { %v1732_v62 = vpop.eup %1731 }
 0x837   :  { %v1180_v63 = vsub.f32 %v2155_v4, %v1178_v61  ;;  %v1181_v0 = vsub.f32 %v2151_v1, %v1178_v61  ;;  %v1177_v60 = vmul.f32 0.6931472, %v1732_v62 }
 0x839   :  { %1184 = vst.msk [vmem:[%s2203_s8] sm:$0xff] %vm851_vm8, %v1180_v63  ;;  %1185 = vst.msk [vmem:[%s2203_s8 + $0x8] sm:$0xff] %vm851_vm8, %v1181_v0  ;;  %v1179_v2 = vadd.f32 %v1177_v60, %v1143_v32 }
 0x83b   :  { %v1182_v5 = vsub.f32 %v2163_v14, %v1179_v2  ;;  %v1183_v3 = vsub.f32 %v2159_v11, %v1179_v2 }
 0x83d   :  { %1186 = vst.msk [vmem:[%s2203_s8 + $0x10] sm:$0xff] %vm851_vm8, %v1182_v5  ;;  %1187 = vst.msk [vmem:[%s2203_s8 + $0x18] sm:$0xff] %vm851_vm8, %v1183_v3 }

</bundles_post_ra>
